<compile_context>
chip_gen: v7x
topology: tpu7x:2x2x1
jax: 0.10.0
libtpu: 0.0.40
codegen_flags: <defaults>
</compile_context>

<pallas_src>
import functools

import jax
import jax.numpy as jnp
from jax.experimental import pallas as pl
from jax.experimental.pallas import tpu as pltpu


def _sparsify_kernel(flows_ref, gumbel_ref, sparse_ref, idx_ref, *,
                     hw: int, num_samples: int, idx_pad: int):
    """One block of batch rows per grid step.

    flows_ref : (2, B, hw)     VMEM  (channel-major: fx page, fy page)
    gumbel_ref: (B, hw)        VMEM  f32 pre-drawn Gumbel noise
    sparse_ref: (3, B, hw)     VMEM  [mask*fx, mask*fy, mask]  (channel-major)
    idx_ref   : (B, idx_pad)   VMEM  int32, selected flat pixel indices in cols [0, num_samples)
    """
    fx = flows_ref[0]                         # (B, hw), dense (sublane=B, lane=hw)
    fy = flows_ref[1]
    b = fx.shape[0]

    # Sampling weights: w = ||flow||_2 / tau.  Top-k of log(w)+Gumbel is invariant to
    # the monotone map w -> w^2*tau^2, so keys = 0.5*log(fx^2+fy^2) + Gumbel suffices
    # (drops the sqrt and the /tau).  All intermediates kept in f32 (v5e-friendly).
    fxf = fx.astype(jnp.float32)
    fyf = fy.astype(jnp.float32)
    keys = 0.5 * jnp.log(fxf * fxf + fyf * fyf) + gumbel_ref[...]   # (B, hw) f32

    # Fuse max+argmax into a single reduction per sample:
    #   f32 key -> order-preserving int32 -> keep top 16 bits, pack lane index in the
    #   low 16 bits (unique per lane).  max(packed) gives the (bf16-quantized) argmax;
    #   quantization only perturbs near-exact key ties (distributionally negligible).
    bits = jax.lax.bitcast_convert_type(keys, jnp.int32)
    sortable = jnp.where(bits < 0, bits ^ jnp.int32(0x7FFFFFFF), bits)
    lane_iota = jax.lax.broadcasted_iota(jnp.int32, (b, hw), 1)
    packed = (sortable & jnp.int32(-65536)) | lane_iota             # (B, hw) int32

    col_iota = jax.lax.broadcasted_iota(jnp.int32, (b, idx_pad), 1)  # hoisted
    mask = jnp.zeros((b, hw), jnp.float32)
    idx_buf = jnp.zeros((b, idx_pad), jnp.int32)
    removed = jnp.int32(jnp.iinfo(jnp.int32).min)

    # num_samples is small and static -> unrolled Gumbel-top-k
    # (== multinomial without replacement with weights `dist`).
    for s in range(num_samples):
        m = jnp.max(packed, axis=-1, keepdims=True)    # (B, 1)  one XLU reduce / sample
        idx = m & jnp.int32(0xFFFF)                    # (B, 1)  winning lane per row
        sel = lane_iota == idx                         # (B, hw) row-wise one-hot
        mask = jnp.where(sel, jnp.float32(1.0), mask)
        packed = jnp.where(sel, removed, packed)       # remove from the pool
        idx_buf = jnp.where(col_iota == s, idx, idx_buf)

    mask_d = mask.astype(sparse_ref.dtype)
    # Single contiguous lane-dense store of all three channels.
    out = jnp.concatenate(
        [(mask_d * fx)[None], (mask_d * fy)[None], mask_d[None]], axis=0)  # (3, B, hw)
    sparse_ref[...] = out
    idx_ref[...] = idx_buf                                                 # lane-dense (padded)


def sparsification_forward(flows, *, num_samples: int, tau: float,
                           threshold: float = 0.0, seed: int = 0,
                           num_vectors: int = None):
    """Pallas implementation of SparsificationNetwork.forward.

    flows: [bs, 2, h, w] (NCHW, same as PyTorch).
    Returns dict with sparse_output [bs,3,h,w], indices [bs,num_samples], masks [bs,1,h,w].
    `threshold` is unused by the reference forward; `tau` only rescales the multinomial
    weights and therefore does not affect the sampling distribution.
    """
    del threshold, tau  # no effect on the forward pass outputs
    if num_vectors is not None:
        num_samples = num_vectors

    bs, c, h, w = flows.shape
    assert c == 2, "flows must have 2 channels"
    hw = h * w
    assert hw <= (1 << 16), "pixel index must fit in 16 bits"
    assert num_samples <= hw

    # Batch blocking: up to 8 rows per grid step (full sublane utilization).
    if bs <= 8:
        b_blk, bs_pad = bs, bs
    else:
        b_blk = 8
        bs_pad = -(-bs // 8) * 8

    # Channel-major flattened layout: (2, bs_pad, hw).
    flows_cm = jnp.transpose(flows.reshape(bs, 2, hw), (1, 0, 2))
    if bs_pad != bs:
        flows_cm = jnp.concatenate(
            [flows_cm, jnp.ones((2, bs_pad - bs, hw), flows_cm.dtype)], axis=1)

    # Gumbel-top-k noise, drawn host-side (the TPU hardware PRNG primitives have no
    # interpret-mode lowering).  Distributionally equivalent to torch.multinomial
    # without replacement; RNG stream differs from torch.
    gumbel = jax.random.gumbel(jax.random.PRNGKey(seed), (bs_pad, hw), dtype=jnp.float32)

    idx_pad = max(128, -(-num_samples // 128) * 128)   # lane-dense indices output

    kernel = functools.partial(
        _sparsify_kernel, hw=hw, num_samples=num_samples, idx_pad=idx_pad)

    sparse_cm, idx_full = pl.pallas_call(
        kernel,
        out_shape=(
            jax.ShapeDtypeStruct((3, bs_pad, hw), flows.dtype),
            jax.ShapeDtypeStruct((bs_pad, idx_pad), jnp.int32),
        ),
        grid=(bs_pad // b_blk,),
        in_specs=[
            pl.BlockSpec((2, b_blk, hw), lambda i: (0, i, 0)),
            pl.BlockSpec((b_blk, hw), lambda i: (i, 0)),
        ],
        out_specs=(
            pl.BlockSpec((3, b_blk, hw), lambda i: (0, i, 0)),
            pl.BlockSpec((b_blk, idx_pad), lambda i: (i, 0)),
        ),
        compiler_params=pltpu.CompilerParams(
            dimension_semantics=("parallel",)),   # batch blocks are independent (v7x: 2 TCs)
    )(flows_cm, gumbel)

    sparse_output = jnp.transpose(sparse_cm[:, :bs, :], (1, 0, 2)).reshape(bs, 3, h, w)
    masks = sparse_output[:, 2:3, :, :]            # exactly the mask channel
    indices = idx_full[:bs, :num_samples]
    return {"sparse_output": sparse_output, "indices": indices, "masks": masks}


if __name__ == "__main__":
    key = jax.random.PRNGKey(0)
    bs, h, w = 2, 16, 16
    num_samples, tau, threshold = 8, 0.5, 0.1

    flows = jax.random.normal(key, (bs, 2, h, w), dtype=jnp.float32)

    out = sparsification_forward(
        flows, num_samples=num_samples, tau=tau, threshold=threshold, seed=1234)
    jax.block_until_ready(out["sparse_output"])

    sparse_output = out["sparse_output"]
    masks = out["masks"]
    indices = out["indices"]

    # Shape / semantic sanity checks.
    assert sparse_output.shape == (bs, 3, h, w)
    assert masks.shape == (bs, 1, h, w)
    assert indices.shape == (bs, num_samples)
    # Sampling without replacement -> exactly num_samples distinct pixels masked.
    counts = jnp.sum(masks.reshape(bs, -1), axis=-1)
    assert bool(jnp.all(counts == num_samples)), counts
    # Sparse flow channels equal mask * flow.
    assert bool(jnp.allclose(sparse_output[:, :2], masks * flows, atol=1e-6))
    # Mask is 1 exactly at the returned indices, and indices are distinct & in range.
    flat_masks = masks.reshape(bs, h * w)
    gathered = jnp.take_along_axis(flat_masks, indices, axis=1)
    assert bool(jnp.all(gathered == 1.0))
    assert bool(jnp.all((indices >= 0) & (indices < h * w)))
    for b in range(bs):
        assert len(set(indices[b].tolist())) == num_samples

    print("KERNEL_OK")
</pallas_src>

<mosaic_0001>
module attributes {stable_mosaic.version = 11 : i64} {
  func.func @_sparsify_kernel(%arg0: i32, %arg1: memref<2x2x256xf32, #tpu.memory_space<vmem>>, %arg2: memref<2x256xf32, #tpu.memory_space<vmem>>, %arg3: memref<3x2x256xf32, #tpu.memory_space<vmem>>, %arg4: memref<2x128xi32, #tpu.memory_space<vmem>>) attributes {dimension_semantics = [#tpu.dimension_semantics<parallel>], iteration_bounds = array<i64: 1>, scalar_prefetch = 0 : i64, scratch_operands = 0 : i64, tpu.core_type = #tpu.core_type<tc>, window_params = [{transform_indices = @transform_0, window_bounds = array<i64: 2, 2, 256>}, {transform_indices = @transform_1, window_bounds = array<i64: 2, 256>}, {transform_indices = @transform_2, window_bounds = array<i64: 3, 2, 256>}, {transform_indices = @transform_3, window_bounds = array<i64: 2, 128>}]} {
    %c0 = arith.constant 0 : index
    %c0_0 = arith.constant 0 : index
    %c0_1 = arith.constant 0 : index
    %0 = vector.load %arg1[%c0, %c0_0, %c0_1] : memref<2x2x256xf32, #tpu.memory_space<vmem>>, vector<1x2x256xf32>
    %1 = vector.shape_cast %0 : vector<1x2x256xf32> to vector<2x256xf32>
    %c1 = arith.constant 1 : index
    %c0_2 = arith.constant 0 : index
    %c0_3 = arith.constant 0 : index
    %2 = vector.load %arg1[%c1, %c0_2, %c0_3] : memref<2x2x256xf32, #tpu.memory_space<vmem>>, vector<1x2x256xf32>
    %3 = vector.shape_cast %2 : vector<1x2x256xf32> to vector<2x256xf32>
    %4 = arith.mulf %1, %1 : vector<2x256xf32>
    %5 = arith.mulf %3, %3 : vector<2x256xf32>
    %6 = arith.addf %4, %5 : vector<2x256xf32>
    %7 = math.log %6 : vector<2x256xf32>
    %cst = arith.constant 5.000000e-01 : f32
    %8 = vector.broadcast %cst : f32 to vector<2x256xf32>
    %9 = arith.mulf %8, %7 : vector<2x256xf32>
    %c0_4 = arith.constant 0 : index
    %c0_5 = arith.constant 0 : index
    %10 = vector.load %arg2[%c0_4, %c0_5] : memref<2x256xf32, #tpu.memory_space<vmem>>, vector<2x256xf32>
    %11 = arith.addf %9, %10 : vector<2x256xf32>
    %12 = tpu.bitcast %11 : vector<2x256xf32> -> vector<2x256xi32>
    %c0_i32 = arith.constant 0 : i32
    %13 = vector.broadcast %c0_i32 : i32 to vector<2x256xi32>
    %14 = arith.cmpi slt, %12, %13 : vector<2x256xi32>
    %c2147483647_i32 = arith.constant 2147483647 : i32
    %15 = vector.broadcast %c2147483647_i32 : i32 to vector<2x256xi32>
    %16 = arith.xori %12, %15 : vector<2x256xi32>
    %17 = arith.select %14, %16, %12 : vector<2x256xi1>, vector<2x256xi32>
    %18 = tpu.iota {dimensions = array<i32: 1>} : vector<2x256xi32>
    %c-65536_i32 = arith.constant -65536 : i32
    %19 = vector.broadcast %c-65536_i32 : i32 to vector<2x256xi32>
    %20 = arith.andi %17, %19 : vector<2x256xi32>
    %21 = arith.ori %20, %18 : vector<2x256xi32>
    %22 = tpu.iota {dimensions = array<i32: 1>} : vector<2x128xi32>
    %cst_6 = arith.constant 0.000000e+00 : f32
    %23 = vector.broadcast %cst_6 : f32 to vector<2x256xf32>
    %c0_i32_7 = arith.constant 0 : i32
    %24 = vector.broadcast %c0_i32_7 : i32 to vector<2x128xi32>
    %cst_8 = arith.constant dense<-2147483648> : vector<2xi32>
    %25 = vector.multi_reduction <maxsi>, %21, %cst_8 [1] : vector<2x256xi32> to vector<2xi32>
    %26 = vector.shape_cast %25 : vector<2xi32> to vector<2x1xi32>
    %c65535_i32 = arith.constant 65535 : i32
    %27 = vector.broadcast %c65535_i32 : i32 to vector<2x1xi32>
    %28 = arith.andi %26, %27 : vector<2x1xi32>
    %29 = vector.broadcast %28 : vector<2x1xi32> to vector<2x256xi32>
    %30 = arith.cmpi eq, %18, %29 : vector<2x256xi32>
    %cst_9 = arith.constant 1.000000e+00 : f32
    %31 = vector.broadcast %cst_9 : f32 to vector<2x256xf32>
    %32 = arith.select %30, %31, %23 : vector<2x256xi1>, vector<2x256xf32>
    %c-2147483648_i32 = arith.constant -2147483648 : i32
    %33 = vector.broadcast %c-2147483648_i32 : i32 to vector<2x256xi32>
    %34 = arith.select %30, %33, %21 : vector<2x256xi1>, vector<2x256xi32>
    %c0_i32_10 = arith.constant 0 : i32
    %35 = vector.broadcast %c0_i32_10 : i32 to vector<2x128xi32>
    %36 = arith.cmpi eq, %22, %35 : vector<2x128xi32>
    %37 = vector.shape_cast %28 : vector<2x1xi32> to vector<2x1xi32>
    %38 = vector.broadcast %37 : vector<2x1xi32> to vector<2x128xi32>
    %39 = arith.select %36, %38, %24 : vector<2x128xi1>, vector<2x128xi32>
    %cst_11 = arith.constant dense<-2147483648> : vector<2xi32>
    %40 = vector.multi_reduction <maxsi>, %34, %cst_11 [1] : vector<2x256xi32> to vector<2xi32>
    %41 = vector.shape_cast %40 : vector<2xi32> to vector<2x1xi32>
    %c65535_i32_12 = arith.constant 65535 : i32
    %42 = vector.broadcast %c65535_i32_12 : i32 to vector<2x1xi32>
    %43 = arith.andi %41, %42 : vector<2x1xi32>
    %44 = vector.broadcast %43 : vector<2x1xi32> to vector<2x256xi32>
    %45 = arith.cmpi eq, %18, %44 : vector<2x256xi32>
    %cst_13 = arith.constant 1.000000e+00 : f32
    %46 = vector.broadcast %cst_13 : f32 to vector<2x256xf32>
    %47 = arith.select %45, %46, %32 : vector<2x256xi1>, vector<2x256xf32>
    %c-2147483648_i32_14 = arith.constant -2147483648 : i32
    %48 = vector.broadcast %c-2147483648_i32_14 : i32 to vector<2x256xi32>
    %49 = arith.select %45, %48, %34 : vector<2x256xi1>, vector<2x256xi32>
    %c1_i32 = arith.constant 1 : i32
    %50 = vector.broadcast %c1_i32 : i32 to vector<2x128xi32>
    %51 = arith.cmpi eq, %22, %50 : vector<2x128xi32>
    %52 = vector.shape_cast %43 : vector<2x1xi32> to vector<2x1xi32>
    %53 = vector.broadcast %52 : vector<2x1xi32> to vector<2x128xi32>
    %54 = arith.select %51, %53, %39 : vector<2x128xi1>, vector<2x128xi32>
    %cst_15 = arith.constant dense<-2147483648> : vector<2xi32>
    %55 = vector.multi_reduction <maxsi>, %49, %cst_15 [1] : vector<2x256xi32> to vector<2xi32>
    %56 = vector.shape_cast %55 : vector<2xi32> to vector<2x1xi32>
    %c65535_i32_16 = arith.constant 65535 : i32
    %57 = vector.broadcast %c65535_i32_16 : i32 to vector<2x1xi32>
    %58 = arith.andi %56, %57 : vector<2x1xi32>
    %59 = vector.broadcast %58 : vector<2x1xi32> to vector<2x256xi32>
    %60 = arith.cmpi eq, %18, %59 : vector<2x256xi32>
    %cst_17 = arith.constant 1.000000e+00 : f32
    %61 = vector.broadcast %cst_17 : f32 to vector<2x256xf32>
    %62 = arith.select %60, %61, %47 : vector<2x256xi1>, vector<2x256xf32>
    %c-2147483648_i32_18 = arith.constant -2147483648 : i32
    %63 = vector.broadcast %c-2147483648_i32_18 : i32 to vector<2x256xi32>
    %64 = arith.select %60, %63, %49 : vector<2x256xi1>, vector<2x256xi32>
    %c2_i32 = arith.constant 2 : i32
    %65 = vector.broadcast %c2_i32 : i32 to vector<2x128xi32>
    %66 = arith.cmpi eq, %22, %65 : vector<2x128xi32>
    %67 = vector.shape_cast %58 : vector<2x1xi32> to vector<2x1xi32>
    %68 = vector.broadcast %67 : vector<2x1xi32> to vector<2x128xi32>
    %69 = arith.select %66, %68, %54 : vector<2x128xi1>, vector<2x128xi32>
    %cst_19 = arith.constant dense<-2147483648> : vector<2xi32>
    %70 = vector.multi_reduction <maxsi>, %64, %cst_19 [1] : vector<2x256xi32> to vector<2xi32>
    %71 = vector.shape_cast %70 : vector<2xi32> to vector<2x1xi32>
    %c65535_i32_20 = arith.constant 65535 : i32
    %72 = vector.broadcast %c65535_i32_20 : i32 to vector<2x1xi32>
    %73 = arith.andi %71, %72 : vector<2x1xi32>
    %74 = vector.broadcast %73 : vector<2x1xi32> to vector<2x256xi32>
    %75 = arith.cmpi eq, %18, %74 : vector<2x256xi32>
    %cst_21 = arith.constant 1.000000e+00 : f32
    %76 = vector.broadcast %cst_21 : f32 to vector<2x256xf32>
    %77 = arith.select %75, %76, %62 : vector<2x256xi1>, vector<2x256xf32>
    %c-2147483648_i32_22 = arith.constant -2147483648 : i32
    %78 = vector.broadcast %c-2147483648_i32_22 : i32 to vector<2x256xi32>
    %79 = arith.select %75, %78, %64 : vector<2x256xi1>, vector<2x256xi32>
    %c3_i32 = arith.constant 3 : i32
    %80 = vector.broadcast %c3_i32 : i32 to vector<2x128xi32>
    %81 = arith.cmpi eq, %22, %80 : vector<2x128xi32>
    %82 = vector.shape_cast %73 : vector<2x1xi32> to vector<2x1xi32>
    %83 = vector.broadcast %82 : vector<2x1xi32> to vector<2x128xi32>
    %84 = arith.select %81, %83, %69 : vector<2x128xi1>, vector<2x128xi32>
    %cst_23 = arith.constant dense<-2147483648> : vector<2xi32>
    %85 = vector.multi_reduction <maxsi>, %79, %cst_23 [1] : vector<2x256xi32> to vector<2xi32>
    %86 = vector.shape_cast %85 : vector<2xi32> to vector<2x1xi32>
    %c65535_i32_24 = arith.constant 65535 : i32
    %87 = vector.broadcast %c65535_i32_24 : i32 to vector<2x1xi32>
    %88 = arith.andi %86, %87 : vector<2x1xi32>
    %89 = vector.broadcast %88 : vector<2x1xi32> to vector<2x256xi32>
    %90 = arith.cmpi eq, %18, %89 : vector<2x256xi32>
    %cst_25 = arith.constant 1.000000e+00 : f32
    %91 = vector.broadcast %cst_25 : f32 to vector<2x256xf32>
    %92 = arith.select %90, %91, %77 : vector<2x256xi1>, vector<2x256xf32>
    %c-2147483648_i32_26 = arith.constant -2147483648 : i32
    %93 = vector.broadcast %c-2147483648_i32_26 : i32 to vector<2x256xi32>
    %94 = arith.select %90, %93, %79 : vector<2x256xi1>, vector<2x256xi32>
    %c4_i32 = arith.constant 4 : i32
    %95 = vector.broadcast %c4_i32 : i32 to vector<2x128xi32>
    %96 = arith.cmpi eq, %22, %95 : vector<2x128xi32>
    %97 = vector.shape_cast %88 : vector<2x1xi32> to vector<2x1xi32>
    %98 = vector.broadcast %97 : vector<2x1xi32> to vector<2x128xi32>
    %99 = arith.select %96, %98, %84 : vector<2x128xi1>, vector<2x128xi32>
    %cst_27 = arith.constant dense<-2147483648> : vector<2xi32>
    %100 = vector.multi_reduction <maxsi>, %94, %cst_27 [1] : vector<2x256xi32> to vector<2xi32>
    %101 = vector.shape_cast %100 : vector<2xi32> to vector<2x1xi32>
    %c65535_i32_28 = arith.constant 65535 : i32
    %102 = vector.broadcast %c65535_i32_28 : i32 to vector<2x1xi32>
    %103 = arith.andi %101, %102 : vector<2x1xi32>
    %104 = vector.broadcast %103 : vector<2x1xi32> to vector<2x256xi32>
    %105 = arith.cmpi eq, %18, %104 : vector<2x256xi32>
    %cst_29 = arith.constant 1.000000e+00 : f32
    %106 = vector.broadcast %cst_29 : f32 to vector<2x256xf32>
    %107 = arith.select %105, %106, %92 : vector<2x256xi1>, vector<2x256xf32>
    %c-2147483648_i32_30 = arith.constant -2147483648 : i32
    %108 = vector.broadcast %c-2147483648_i32_30 : i32 to vector<2x256xi32>
    %109 = arith.select %105, %108, %94 : vector<2x256xi1>, vector<2x256xi32>
    %c5_i32 = arith.constant 5 : i32
    %110 = vector.broadcast %c5_i32 : i32 to vector<2x128xi32>
    %111 = arith.cmpi eq, %22, %110 : vector<2x128xi32>
    %112 = vector.shape_cast %103 : vector<2x1xi32> to vector<2x1xi32>
    %113 = vector.broadcast %112 : vector<2x1xi32> to vector<2x128xi32>
    %114 = arith.select %111, %113, %99 : vector<2x128xi1>, vector<2x128xi32>
    %cst_31 = arith.constant dense<-2147483648> : vector<2xi32>
    %115 = vector.multi_reduction <maxsi>, %109, %cst_31 [1] : vector<2x256xi32> to vector<2xi32>
    %116 = vector.shape_cast %115 : vector<2xi32> to vector<2x1xi32>
    %c65535_i32_32 = arith.constant 65535 : i32
    %117 = vector.broadcast %c65535_i32_32 : i32 to vector<2x1xi32>
    %118 = arith.andi %116, %117 : vector<2x1xi32>
    %119 = vector.broadcast %118 : vector<2x1xi32> to vector<2x256xi32>
    %120 = arith.cmpi eq, %18, %119 : vector<2x256xi32>
    %cst_33 = arith.constant 1.000000e+00 : f32
    %121 = vector.broadcast %cst_33 : f32 to vector<2x256xf32>
    %122 = arith.select %120, %121, %107 : vector<2x256xi1>, vector<2x256xf32>
    %c-2147483648_i32_34 = arith.constant -2147483648 : i32
    %123 = vector.broadcast %c-2147483648_i32_34 : i32 to vector<2x256xi32>
    %124 = arith.select %120, %123, %109 : vector<2x256xi1>, vector<2x256xi32>
    %c6_i32 = arith.constant 6 : i32
    %125 = vector.broadcast %c6_i32 : i32 to vector<2x128xi32>
    %126 = arith.cmpi eq, %22, %125 : vector<2x128xi32>
    %127 = vector.shape_cast %118 : vector<2x1xi32> to vector<2x1xi32>
    %128 = vector.broadcast %127 : vector<2x1xi32> to vector<2x128xi32>
    %129 = arith.select %126, %128, %114 : vector<2x128xi1>, vector<2x128xi32>
    %cst_35 = arith.constant dense<-2147483648> : vector<2xi32>
    %130 = vector.multi_reduction <maxsi>, %124, %cst_35 [1] : vector<2x256xi32> to vector<2xi32>
    %131 = vector.shape_cast %130 : vector<2xi32> to vector<2x1xi32>
    %c65535_i32_36 = arith.constant 65535 : i32
    %132 = vector.broadcast %c65535_i32_36 : i32 to vector<2x1xi32>
    %133 = arith.andi %131, %132 : vector<2x1xi32>
    %134 = vector.broadcast %133 : vector<2x1xi32> to vector<2x256xi32>
    %135 = arith.cmpi eq, %18, %134 : vector<2x256xi32>
    %cst_37 = arith.constant 1.000000e+00 : f32
    %136 = vector.broadcast %cst_37 : f32 to vector<2x256xf32>
    %137 = arith.select %135, %136, %122 : vector<2x256xi1>, vector<2x256xf32>
    %c7_i32 = arith.constant 7 : i32
    %138 = vector.broadcast %c7_i32 : i32 to vector<2x128xi32>
    %139 = arith.cmpi eq, %22, %138 : vector<2x128xi32>
    %140 = vector.shape_cast %133 : vector<2x1xi32> to vector<2x1xi32>
    %141 = vector.broadcast %140 : vector<2x1xi32> to vector<2x128xi32>
    %142 = arith.select %139, %141, %129 : vector<2x128xi1>, vector<2x128xi32>
    %143 = arith.mulf %137, %1 : vector<2x256xf32>
    %144 = vector.shape_cast %143 : vector<2x256xf32> to vector<1x2x256xf32>
    %145 = arith.mulf %137, %3 : vector<2x256xf32>
    %146 = vector.shape_cast %145 : vector<2x256xf32> to vector<1x2x256xf32>
    %147 = vector.shape_cast %137 : vector<2x256xf32> to vector<1x2x256xf32>
    %148 = tpu.concatenate %144, %146, %147 in 0 : vector<1x2x256xf32>, vector<1x2x256xf32>, vector<1x2x256xf32> -> vector<3x2x256xf32>
    %c0_38 = arith.constant 0 : index
    %c0_39 = arith.constant 0 : index
    %c0_40 = arith.constant 0 : index
    %149 = vector.load %arg3[%c0_38, %c0_39, %c0_40] : memref<3x2x256xf32, #tpu.memory_space<vmem>>, vector<3x2x256xf32>
    tpu.vector_store %arg3[%c0_38, %c0_39, %c0_40], %148 {strides = array<i32>} : memref<3x2x256xf32, #tpu.memory_space<vmem>>, vector<3x2x256xf32>,
    %c0_41 = arith.constant 0 : index
    %c0_42 = arith.constant 0 : index
    %150 = vector.load %arg4[%c0_41, %c0_42] : memref<2x128xi32, #tpu.memory_space<vmem>>, vector<2x128xi32>
    tpu.vector_store %arg4[%c0_41, %c0_42], %142 {strides = array<i32>} : memref<2x128xi32, #tpu.memory_space<vmem>>, vector<2x128xi32>,
    return
  }
  func.func @transform_0(%arg0: i32) -> (i32, i32, i32) {
    %c0_i32 = arith.constant 0 : i32
    %c0_i32_0 = arith.constant 0 : i32
    %c0_i32_1 = arith.constant 0 : i32
    return %c0_i32, %arg0, %c0_i32_0 : i32, i32, i32
  }
  func.func @transform_1(%arg0: i32) -> (i32, i32) {
    %c0_i32 = arith.constant 0 : i32
    %c0_i32_0 = arith.constant 0 : i32
    return %arg0, %c0_i32 : i32, i32
  }
  func.func @transform_2(%arg0: i32) -> (i32, i32, i32) {
    %c0_i32 = arith.constant 0 : i32
    %c0_i32_0 = arith.constant 0 : i32
    %c0_i32_1 = arith.constant 0 : i32
    return %c0_i32, %arg0, %c0_i32_0 : i32, i32, i32
  }
  func.func @transform_3(%arg0: i32) -> (i32, i32) {
    %c0_i32 = arith.constant 0 : i32
    %c0_i32_0 = arith.constant 0 : i32
    return %arg0, %c0_i32 : i32, i32
  }
}

</mosaic_0001>

<bundles_post_ra>
// kernel: tpu_custom_call.1
= control target key start
LH: loop header
LB: loop body
LE: loop exit
PB: predicated region body
PF: predicated region fallthrough
CT: control target
= control target key end

     0   :  { %9 = vsyncpa [#allocation3], 0  ;;  %s645_s0 = inlined_call_operand.hbm [shape: f32[2,2,256], index: 0, kind: input, shape index: {}]   ;;  %s646_s1 = inlined_call_operand.hbm [shape: f32[2,256], index: 1, kind: input, shape index: {}]   ;;  %s647_s2 = inlined_call_operand.hbm [shape: f32[3,2,256], index: 2, kind: output, shape index: {0}]   ;;  %s648_s3 = inlined_call_operand.hbm [shape: s32[2,128], index: 3, kind: output, shape index: {1}]  }
   0x1   :  { %10 = vsyncpa [#allocation6], 0 }
   0x2   :  { %11 = vsyncpa [#allocation4], 0 }
   0x3   :  { %12 = vsyncpa [#allocation9], 0  ;;  %s493_s12 = smov [#allocation2]   ;;  %s397_s16 = scalar_lea.hbm %s645_s0, 128 }
   0x4   :  { %s18_s13 = sshll.u32 %s493_s12, 4  ;;  %p398_p0 = scmp.ne.s32.totalorder %s645_s0, %s397_s16  ;;  %s19_s13 = int_to_ptr.vmem [resolvable:$true] %s18_s13 }
   0x5   :  { %p401_p1 = scmp.lt.u32.totalorder %s397_s16, %s645_s0 }
   0x7   :  { %p403_p2 = pnand %p401_p1, %p398_p0 }
   0x9   :  { %406 = shalt.err (!%p403_p2)
}
   0xa   :  { %s407_s21 = scalar_lea.vmem %s19_s13, 128  ;;  %p412_p4 = scmp.lt.s32.totalorder %s19_s13, %s19_s13 }
   0xb   :  { %p408_p3 = scmp.ne.s32.totalorder %s19_s13, %s407_s21  ;;  %p413_p5 = scmp.lt.s32.totalorder %s407_s21, %s407_s21 }
   0xd   :  { %p414_p6 = por %p413_p5, %p412_p4 }
   0xf   :  { %p415_p7 = pnand %p414_p6, %p408_p3 }
  0x11   :  { %418 = shalt.err (!%p415_p7)
}
  0x12   :  { %s494_s22 = smov 64   ;;  %s495_s23 = smov 4  }
  0x13   :  { %24 = dma.hbm_to_vmem [thread:$0]  %s645_s0, 128, %s19_s13, [#allocation3], %s494_s22, %s494_s22, %s495_s23  }
  0x14   :  { %s496_s26 = smov [#allocation5]   ;;  %s419_s30 = scalar_lea.hbm %s646_s1, 64 }
  0x15   :  { %s31_s27 = sshll.u32 %s496_s26, 4  ;;  %p420_p8 = scmp.ne.s32.totalorder %s646_s1, %s419_s30  ;;  %s32_s27 = int_to_ptr.vmem [resolvable:$true] %s31_s27 }
  0x16   :  { %p423_p9 = scmp.lt.u32.totalorder %s419_s30, %s646_s1 }
  0x18   :  { %p425_p10 = pnand %p423_p9, %p420_p8 }
  0x1a   :  { %428 = shalt.err (!%p425_p10)
}
  0x1b   :  { %s429_s8 = scalar_lea.vmem %s32_s27, 64  ;;  %p434_p12 = scmp.lt.s32.totalorder %s32_s27, %s32_s27 }
  0x1c   :  { %p430_p11 = scmp.ne.s32.totalorder %s32_s27, %s429_s8  ;;  %p435_p13 = scmp.lt.s32.totalorder %s429_s8, %s429_s8 }
  0x1e   :  { %p436_p0 = por %p435_p13, %p434_p12 }
  0x20   :  { %p437_p1 = pnand %p436_p0, %p430_p11 }
  0x22   :  { %440 = shalt.err (!%p437_p1)
}
  0x23   :  { %34 = dma.hbm_to_vmem [thread:$0]  %s646_s1, 64, %s32_s27, [#allocation6]  }
  0x24   :  { %485 = dma.done.wait [#allocation3], 128  }
  0x25   :  { %486 = vsyncadd [#allocation3], 4294967168 }
  0x26   :  { %487 = dma.done.wait [#allocation6], 64  }
  0x27   :  { %488 = vsyncadd [#allocation6], 4294967232  ;;  %v548_v0 = vld [vmem:[#allocation2] sm:$0xf]  ;;  %v550_v1 = vld [vmem:[#allocation2 + $0x4] sm:$0xf]  ;;  %v56_v7 = vlaneseq }
  0x28   :  { %v44_v2 = vmul.f32 %v548_v0, %v548_v0  ;;  %v45_v3 = vmul.f32 %v550_v1, %v550_v1  ;;  %v497_v5 = vmov 1983009808   ;;  %v50_v12 = vld [vmem:[#allocation5] sm:$0xf]  ;;  %vm74_vm2 = vcmask 1041408   ;;  %s499_s1 = smov [#allocation8]  }
  0x29   :  { %v54_v6 = vunpack.c.l.s4 %v497_v5  ;;  %v57_v9 = vshrl.u32 %v56_v7, 7  ;;  %v559_v17 = vand.u32 127, %v56_v7  ;;  %v498_v61 = vmov 0.0   ;;  %s370_s10 = sshll.u32 %s499_s1, 4  ;;  %s500_s11 = smov [#allocation7]   ;;  %s371_s10 = int_to_ptr.vmem [resolvable:$true] %s370_s10 }
  0x2a   :  { %v46_v4 = vadd.f32 %v45_v3, %v44_v2  ;;  %s357_s12 = sshll.u32 %s500_s11, 4  ;;  %s441_s13 = scalar_lea.vmem %s371_s10, 32  ;;  %s358_s12 = int_to_ptr.vmem [resolvable:$true] %s357_s12 }
  0x2b   :  { %v55_v8 = vunpack.c.0.s8 %v54_v6  ;;  %v562_v22 = vadd.s32 128, %v559_v17  ;;  %vm100_vm9 = vcmp.eq.s32.totalorder %v559_v17, 0  ;;  %vm127_vm10 = vcmp.eq.s32.totalorder %v559_v17, 1  ;;  %p442_p2 = scmp.ne.s32.totalorder %s371_s10, %s441_s13  ;;  %p446_p3 = scmp.lt.s32.totalorder %s371_s10, %s371_s10 }
  0x2c   :  { %395 = vlog2.f32 %v46_v4  ;;  %vm154_vm15 = vcmp.eq.s32.totalorder %v559_v17, 2  ;;  %p447_p4 = scmp.lt.s32.totalorder %s441_s13, %s441_s13 }
  0x2d   :  { %v556_v14 = vsub.s32 %v55_v8, %v57_v9 }
  0x2e   :  { %p448_p5 = por %p447_p4, %p446_p3 }
  0x30   :  { %p449_p6 = pnand %p448_p5, %p442_p2 }
  0x36   :  { %v396_v10 = vpop.eup %395 }
  0x37   :  { %v48_v11 = vmul.f32 0.6931472, %v396_v10 }
  0x39   :  { %v49_v13 = vmul.f32 0.5, %v48_v11 }
  0x3b   :  { %v51_v15 = vadd.f32 %v50_v12, %v49_v13 }
  0x3d   :  { %v59_v16 = vrot.slane %v51_v15, %v556_v14 }
  0x3f   :  { %v60_v18 = vcombine.high %v59_v16, %v59_v16  ;;  %vm61_vm0 = vcmp.lt.s32.totalorder %v59_v16, 0  ;;  %v63_v19 = vxor.u32 2147483647, %v59_v16 }
  0x41   :  { %vm62_vm1 = vcmp.lt.s32.totalorder %v60_v18, 0  ;;  %v64_v20 = vxor.u32 2147483647, %v60_v18  ;;  %v65_v21 = vsel %vm61_vm0, %v63_v19, %v59_v16 }
  0x42   :  { %v70_v23 = vand.u32 4294901760, %v65_v21 }
  0x43   :  { %v66_v24 = vsel %vm62_vm1, %v64_v20, %v60_v18 }
  0x44   :  { %v71_v25 = vand.u32 4294901760, %v66_v24  ;;  %v72_v26 = vor.u32 %v70_v23, %v559_v17 }
  0x46   :  { %v73_v27 = vor.u32 %v71_v25, %v562_v22  ;;  %v75_v28 = vsel %vm74_vm2, %v72_v26, 2147483648 }
  0x48   :  { %v76_v29 = vsel %vm74_vm2, %v73_v27, 2147483648 }
  0x49   :  { %vm77_vm3 = vcmp.gt.s32.totalorder %v75_v28, %v76_v29 }
  0x4a   :  { %v78_v30 = vsel %vm77_vm3, %v75_v28, %v76_v29 }
  0x4b   :  { %v80_v31 = vshra.s32 %v78_v30, 16  ;;  %v79_v33 = vand.u32 65535, %v78_v30 }
  0x4d   :  { %v82_v32 = vcvt.s32.f32 %v80_v31  ;;  %v81_v34 = vcvt.s32.f32 %v79_v33 }
  0x4f   :  { %83 = vmax.xlane.f32.xlu0 %v82_v32 }
  0xdc   :  { %v84_v35 = vpop.xlane.xlu0 %83 }
  0xdd   :  { %vm85_vm4 = vcmp.eq.f32.partialorder %v82_v32, %v84_v35  ;;  %v90_v37 = vcvt.f32.s32 %v84_v35 }
  0xde   :  { %v86_v36 = vsel %vm85_vm4, %v81_v34, -inf }
  0xdf   :  { %87 = vmax.xlane.f32.xlu0 %v86_v36  ;;  %v91_v39 = vshll.u32 %v90_v37, 16 }
 0x16c   :  { %v88_v38 = vpop.xlane.xlu0 %87 }
 0x16d   :  { %v89_v40 = vcvt.f32.s32 %v88_v38 }
 0x16f   :  { %v92_v41 = vadd.s32 %v91_v39, %v89_v40 }
 0x171   :  { %v93_v42 = vand.u32 65535, %v92_v41 }
 0x173   :  { %vm94_vm5 = vcmp.eq.s32.totalorder %v559_v17, %v93_v42  ;;  %vm95_vm6 = vcmp.eq.s32.totalorder %v562_v22, %v93_v42  ;;  %v101_v60 = vsel %vm100_vm9, %v93_v42, 0 }
 0x174   :  { %v98_v43 = vsel %vm94_vm5, 2147483648, %v72_v26  ;;  %v99_v44 = vsel %vm95_vm6, 2147483648, %v73_v27  ;;  %v97_v62 = vsel %vm95_vm6, 1.0, %v498_v61  ;;  %v96_v63 = vsel %vm94_vm5, 1.0, %v498_v61 }
 0x175   :  { %v102_v45 = vsel %vm74_vm2, %v98_v43, 2147483648  ;;  %v103_v46 = vsel %vm74_vm2, %v99_v44, 2147483648  ;;  %vm181_vm5 = vcmp.eq.s32.totalorder %v559_v17, 3 }
 0x176   :  { %vm104_vm7 = vcmp.gt.s32.totalorder %v102_v45, %v103_v46 }
 0x177   :  { %v105_v47 = vsel %vm104_vm7, %v102_v45, %v103_v46 }
 0x178   :  { %v107_v48 = vshra.s32 %v105_v47, 16  ;;  %v106_v50 = vand.u32 65535, %v105_v47 }
 0x17a   :  { %v109_v49 = vcvt.s32.f32 %v107_v48  ;;  %v108_v52 = vcvt.s32.f32 %v106_v50 }
 0x17c   :  { %110 = vmax.xlane.f32.xlu1 %v109_v49 }
 0x209   :  { %v111_v51 = vpop.xlane.xlu1 %110 }
 0x20a   :  { %vm112_vm8 = vcmp.eq.f32.partialorder %v109_v49, %v111_v51  ;;  %v117_v54 = vcvt.f32.s32 %v111_v51 }
 0x20b   :  { %v113_v53 = vsel %vm112_vm8, %v108_v52, -inf }
 0x20c   :  { %114 = vmax.xlane.f32.xlu1 %v113_v53  ;;  %v118_v56 = vshll.u32 %v117_v54, 16 }
 0x299   :  { %v115_v55 = vpop.xlane.xlu1 %114 }
 0x29a   :  { %v116_v57 = vcvt.f32.s32 %v115_v55 }
 0x29c   :  { %v119_v58 = vadd.s32 %v118_v56, %v116_v57 }
 0x29e   :  { %v120_v59 = vand.u32 65535, %v119_v58 }
 0x2a0   :  { %v128_v2 = vsel %vm127_vm10, %v120_v59, %v101_v60  ;;  %vm121_vm11 = vcmp.eq.s32.totalorder %v559_v17, %v120_v59  ;;  %vm122_vm12 = vcmp.eq.s32.totalorder %v562_v22, %v120_v59  ;;  %vm208_vm10 = vcmp.eq.s32.totalorder %v559_v17, 4 }
 0x2a1   :  { %v124_v3 = vsel %vm122_vm12, 1.0, %v97_v62  ;;  %v125_v4 = vsel %vm121_vm11, 2147483648, %v98_v43  ;;  %v126_v5 = vsel %vm122_vm12, 2147483648, %v99_v44  ;;  %v123_v6 = vsel %vm121_vm11, 1.0, %v96_v63 }
 0x2a2   :  { %v129_v7 = vsel %vm74_vm2, %v125_v4, 2147483648  ;;  %v130_v8 = vsel %vm74_vm2, %v126_v5, 2147483648 }
 0x2a3   :  { %vm131_vm13 = vcmp.gt.s32.totalorder %v129_v7, %v130_v8 }
 0x2a4   :  { %v132_v9 = vsel %vm131_vm13, %v129_v7, %v130_v8 }
 0x2a5   :  { %v134_v10 = vshra.s32 %v132_v9, 16  ;;  %v133_v12 = vand.u32 65535, %v132_v9 }
 0x2a7   :  { %v136_v11 = vcvt.s32.f32 %v134_v10  ;;  %v135_v15 = vcvt.s32.f32 %v133_v12 }
 0x2a9   :  { %137 = vmax.xlane.f32.xlu0 %v136_v11 }
 0x336   :  { %v138_v13 = vpop.xlane.xlu0 %137 }
 0x337   :  { %vm139_vm14 = vcmp.eq.f32.partialorder %v136_v11, %v138_v13  ;;  %v144_v18 = vcvt.f32.s32 %v138_v13 }
 0x338   :  { %v140_v16 = vsel %vm139_vm14, %v135_v15, -inf }
 0x339   :  { %141 = vmax.xlane.f32.xlu1 %v140_v16  ;;  %v145_v20 = vshll.u32 %v144_v18, 16 }
 0x3c6   :  { %v142_v19 = vpop.xlane.xlu1 %141 }
 0x3c7   :  { %v143_v21 = vcvt.f32.s32 %v142_v19 }
 0x3c9   :  { %v146_v23 = vadd.s32 %v145_v20, %v143_v21 }
 0x3cb   :  { %v147_v24 = vand.u32 65535, %v146_v23 }
 0x3cd   :  { %v155_v25 = vsel %vm154_vm15, %v147_v24, %v128_v2  ;;  %vm148_vm0 = vcmp.eq.s32.totalorder %v559_v17, %v147_v24  ;;  %vm149_vm1 = vcmp.eq.s32.totalorder %v562_v22, %v147_v24  ;;  %vm235_vm15 = vcmp.eq.s32.totalorder %v559_v17, 5 }
 0x3ce   :  { %v151_v26 = vsel %vm149_vm1, 1.0, %v124_v3  ;;  %v152_v27 = vsel %vm148_vm0, 2147483648, %v125_v4  ;;  %v153_v28 = vsel %vm149_vm1, 2147483648, %v126_v5  ;;  %v150_v29 = vsel %vm148_vm0, 1.0, %v123_v6 }
 0x3cf   :  { %v156_v30 = vsel %vm74_vm2, %v152_v27, 2147483648  ;;  %v157_v31 = vsel %vm74_vm2, %v153_v28, 2147483648 }
 0x3d0   :  { %vm158_vm3 = vcmp.gt.s32.totalorder %v156_v30, %v157_v31 }
 0x3d1   :  { %v159_v32 = vsel %vm158_vm3, %v156_v30, %v157_v31 }
 0x3d2   :  { %v161_v33 = vshra.s32 %v159_v32, 16  ;;  %v160_v35 = vand.u32 65535, %v159_v32 }
 0x3d4   :  { %v163_v34 = vcvt.s32.f32 %v161_v33  ;;  %v162_v37 = vcvt.s32.f32 %v160_v35 }
 0x3d6   :  { %164 = vmax.xlane.f32.xlu0 %v163_v34 }
 0x463   :  { %v165_v36 = vpop.xlane.xlu0 %164 }
 0x464   :  { %vm166_vm4 = vcmp.eq.f32.partialorder %v163_v34, %v165_v36  ;;  %v171_v39 = vcvt.f32.s32 %v165_v36 }
 0x465   :  { %v167_v38 = vsel %vm166_vm4, %v162_v37, -inf }
 0x466   :  { %168 = vmax.xlane.f32.xlu1 %v167_v38  ;;  %v172_v41 = vshll.u32 %v171_v39, 16 }
 0x4f3   :  { %v169_v40 = vpop.xlane.xlu1 %168 }
 0x4f4   :  { %v170_v42 = vcvt.f32.s32 %v169_v40 }
 0x4f6   :  { %v173_v43 = vadd.s32 %v172_v41, %v170_v42 }
 0x4f8   :  { %v174_v44 = vand.u32 65535, %v173_v43 }
 0x4fa   :  { %v182_v45 = vsel %vm181_vm5, %v174_v44, %v155_v25  ;;  %vm175_vm6 = vcmp.eq.s32.totalorder %v559_v17, %v174_v44  ;;  %vm176_vm7 = vcmp.eq.s32.totalorder %v562_v22, %v174_v44  ;;  %vm262_vm5 = vcmp.eq.s32.totalorder %v559_v17, 6 }
 0x4fb   :  { %v178_v46 = vsel %vm176_vm7, 1.0, %v151_v26  ;;  %v179_v47 = vsel %vm175_vm6, 2147483648, %v152_v27  ;;  %v180_v48 = vsel %vm176_vm7, 2147483648, %v153_v28  ;;  %v177_v49 = vsel %vm175_vm6, 1.0, %v150_v29 }
 0x4fc   :  { %v183_v50 = vsel %vm74_vm2, %v179_v47, 2147483648  ;;  %v184_v51 = vsel %vm74_vm2, %v180_v48, 2147483648 }
 0x4fd   :  { %vm185_vm8 = vcmp.gt.s32.totalorder %v183_v50, %v184_v51 }
 0x4fe   :  { %v186_v52 = vsel %vm185_vm8, %v183_v50, %v184_v51 }
 0x4ff   :  { %v188_v53 = vshra.s32 %v186_v52, 16  ;;  %v187_v55 = vand.u32 65535, %v186_v52 }
 0x501   :  { %v190_v54 = vcvt.s32.f32 %v188_v53  ;;  %v189_v57 = vcvt.s32.f32 %v187_v55 }
 0x503   :  { %191 = vmax.xlane.f32.xlu0 %v190_v54 }
 0x590   :  { %v192_v56 = vpop.xlane.xlu0 %191 }
 0x591   :  { %vm193_vm9 = vcmp.eq.f32.partialorder %v190_v54, %v192_v56  ;;  %v198_v59 = vcvt.f32.s32 %v192_v56 }
 0x592   :  { %v194_v58 = vsel %vm193_vm9, %v189_v57, -inf }
 0x593   :  { %195 = vmax.xlane.f32.xlu1 %v194_v58  ;;  %v199_v61 = vshll.u32 %v198_v59, 16 }
 0x620   :  { %v196_v60 = vpop.xlane.xlu1 %195 }
 0x621   :  { %v197_v62 = vcvt.f32.s32 %v196_v60 }
 0x623   :  { %v200_v63 = vadd.s32 %v199_v61, %v197_v62 }
 0x625   :  { %v201_v2 = vand.u32 65535, %v200_v63 }
 0x627   :  { %v209_v3 = vsel %vm208_vm10, %v201_v2, %v182_v45  ;;  %vm202_vm11 = vcmp.eq.s32.totalorder %v559_v17, %v201_v2  ;;  %vm203_vm12 = vcmp.eq.s32.totalorder %v562_v22, %v201_v2  ;;  %v296_v2 = vrot.slane %v548_v0, %v556_v14 }
 0x628   :  { %v205_v4 = vsel %vm203_vm12, 1.0, %v178_v46  ;;  %v206_v5 = vsel %vm202_vm11, 2147483648, %v179_v47  ;;  %v207_v6 = vsel %vm203_vm12, 2147483648, %v180_v48  ;;  %v204_v7 = vsel %vm202_vm11, 1.0, %v177_v49 }
 0x629   :  { %v210_v8 = vsel %vm74_vm2, %v206_v5, 2147483648  ;;  %v211_v9 = vsel %vm74_vm2, %v207_v6, 2147483648 }
 0x62a   :  { %vm212_vm13 = vcmp.gt.s32.totalorder %v210_v8, %v211_v9 }
 0x62b   :  { %v213_v10 = vsel %vm212_vm13, %v210_v8, %v211_v9 }
 0x62c   :  { %v215_v11 = vshra.s32 %v213_v10, 16  ;;  %v214_v13 = vand.u32 65535, %v213_v10 }
 0x62e   :  { %v217_v12 = vcvt.s32.f32 %v215_v11  ;;  %v216_v16 = vcvt.s32.f32 %v214_v13 }
 0x630   :  { %218 = vmax.xlane.f32.xlu0 %v217_v12 }
 0x6bd   :  { %v219_v15 = vpop.xlane.xlu0 %218 }
 0x6be   :  { %vm220_vm14 = vcmp.eq.f32.partialorder %v217_v12, %v219_v15  ;;  %v225_v19 = vcvt.f32.s32 %v219_v15 }
 0x6bf   :  { %v221_v18 = vsel %vm220_vm14, %v216_v16, -inf }
 0x6c0   :  { %222 = vmax.xlane.f32.xlu1 %v221_v18  ;;  %v226_v21 = vshll.u32 %v225_v19, 16 }
 0x74d   :  { %v223_v20 = vpop.xlane.xlu1 %222 }
 0x74e   :  { %v224_v23 = vcvt.f32.s32 %v223_v20 }
 0x750   :  { %v227_v24 = vadd.s32 %v226_v21, %v224_v23 }
 0x752   :  { %v228_v25 = vand.u32 65535, %v227_v24 }
 0x754   :  { %vm229_vm0 = vcmp.eq.s32.totalorder %v559_v17, %v228_v25  ;;  %vm230_vm1 = vcmp.eq.s32.totalorder %v562_v22, %v228_v25  ;;  %v236_v26 = vsel %vm235_vm15, %v228_v25, %v209_v3  ;;  %v309_v3 = vrot.slane %v550_v1, %v556_v14 }
 0x755   :  { %v232_v27 = vsel %vm230_vm1, 1.0, %v205_v4  ;;  %v233_v28 = vsel %vm229_vm0, 2147483648, %v206_v5  ;;  %v234_v29 = vsel %vm230_vm1, 2147483648, %v207_v6  ;;  %v231_v30 = vsel %vm229_vm0, 1.0, %v204_v7 }
 0x756   :  { %v237_v31 = vsel %vm74_vm2, %v233_v28, 2147483648  ;;  %v238_v32 = vsel %vm74_vm2, %v234_v29, 2147483648  ;;  %v297_v6 = vcombine.high %v296_v2, %v296_v2  ;;  %v310_v7 = vcombine.high %v309_v3, %v309_v3 }
 0x757   :  { %vm239_vm3 = vcmp.gt.s32.totalorder %v237_v31, %v238_v32 }
 0x758   :  { %v240_v33 = vsel %vm239_vm3, %v237_v31, %v238_v32 }
 0x759   :  { %v242_v34 = vshra.s32 %v240_v33, 16  ;;  %v241_v36 = vand.u32 65535, %v240_v33 }
 0x75b   :  { %v244_v35 = vcvt.s32.f32 %v242_v34  ;;  %v243_v38 = vcvt.s32.f32 %v241_v36 }
 0x75d   :  { %245 = vmax.xlane.f32.xlu0 %v244_v35 }
 0x7ea   :  { %v246_v37 = vpop.xlane.xlu0 %245 }
 0x7eb   :  { %vm247_vm4 = vcmp.eq.f32.partialorder %v244_v35, %v246_v37  ;;  %v252_v40 = vcvt.f32.s32 %v246_v37 }
 0x7ec   :  { %v248_v39 = vsel %vm247_vm4, %v243_v38, -inf }
 0x7ed   :  { %249 = vmax.xlane.f32.xlu1 %v248_v39  ;;  %v253_v42 = vshll.u32 %v252_v40, 16 }
 0x87a   :  { %v250_v41 = vpop.xlane.xlu1 %249 }
 0x87b   :  { %v251_v43 = vcvt.f32.s32 %v250_v41 }
 0x87d   :  { %v254_v44 = vadd.s32 %v253_v42, %v251_v43 }
 0x87f   :  { %v255_v45 = vand.u32 65535, %v254_v44 }
 0x881   :  { %vm256_vm6 = vcmp.eq.s32.totalorder %v559_v17, %v255_v45  ;;  %vm257_vm7 = vcmp.eq.s32.totalorder %v562_v22, %v255_v45  ;;  %v263_v46 = vsel %vm262_vm5, %v255_v45, %v236_v26 }
 0x882   :  { %v259_v47 = vsel %vm257_vm7, 1.0, %v232_v27  ;;  %v260_v48 = vsel %vm256_vm6, 2147483648, %v233_v28  ;;  %v261_v49 = vsel %vm257_vm7, 2147483648, %v234_v29  ;;  %v258_v50 = vsel %vm256_vm6, 1.0, %v231_v30 }
 0x883   :  { %v264_v51 = vsel %vm74_vm2, %v260_v48, 2147483648  ;;  %v265_v52 = vsel %vm74_vm2, %v261_v49, 2147483648  ;;  %vm287_vm2 = vcmp.eq.s32.totalorder %v559_v17, 7 }
 0x884   :  { %vm266_vm8 = vcmp.gt.s32.totalorder %v264_v51, %v265_v52 }
 0x885   :  { %v267_v53 = vsel %vm266_vm8, %v264_v51, %v265_v52 }
 0x886   :  { %v269_v54 = vshra.s32 %v267_v53, 16  ;;  %v268_v56 = vand.u32 65535, %v267_v53 }
 0x888   :  { %v271_v55 = vcvt.s32.f32 %v269_v54  ;;  %v270_v58 = vcvt.s32.f32 %v268_v56 }
 0x88a   :  { %272 = vmax.xlane.f32.xlu0 %v271_v55 }
 0x917   :  { %v273_v57 = vpop.xlane.xlu0 %272 }
 0x918   :  { %vm274_vm9 = vcmp.eq.f32.partialorder %v271_v55, %v273_v57  ;;  %v279_v60 = vcvt.f32.s32 %v273_v57 }
 0x919   :  { %v275_v59 = vsel %vm274_vm9, %v270_v58, -inf }
 0x91a   :  { %276 = vmax.xlane.f32.xlu1 %v275_v59  ;;  %v280_v62 = vshll.u32 %v279_v60, 16 }
 0x9a7   :  { %v277_v61 = vpop.xlane.xlu1 %276 }
 0x9a8   :  { %v278_v63 = vcvt.f32.s32 %v277_v61 }
 0x9aa   :  { %v281_v4 = vadd.s32 %v280_v62, %v278_v63 }
 0x9ac   :  { %v282_v5 = vand.u32 65535, %v281_v4 }
 0x9ae   :  { %vm283_vm10 = vcmp.eq.s32.totalorder %v559_v17, %v282_v5  ;;  %vm284_vm11 = vcmp.eq.s32.totalorder %v562_v22, %v282_v5  ;;  %v288_v8 = vsel %vm287_vm2, %v282_v5, %v263_v46 }
 0x9af   :  { %v285_v9 = vsel %vm283_vm10, 1.0, %v258_v50  ;;  %v286_v10 = vsel %vm284_vm11, 1.0, %v259_v47  ;;  %351 = vst [vmem:[#allocation8] sm:$0x3] %v288_v8 }
 0x9b0   :  { %v300_v0 = vmul.f32 %v296_v2, %v285_v9  ;;  %v301_v1 = vmul.f32 %v297_v6, %v286_v10  ;;  %v313_v14 = vmul.f32 %v309_v3, %v285_v9  ;;  %v314_v11 = vmul.f32 %v310_v7, %v286_v10 }
 0x9b1   :  { %452 = shalt.err (!%p449_p6)
}
 0x9b2   :  { %s453_s16 = scalar_lea.hbm %s648_s3, 32 }
 0x9b3   :  { %p454_p7 = scmp.ne.s32.totalorder %s648_s3, %s453_s16  ;;  %p457_p8 = scmp.lt.u32.totalorder %s453_s16, %s648_s3 }
 0x9b5   :  { %p459_p9 = pnand %p457_p8, %p454_p7 }
 0x9b7   :  { %462 = shalt.err (!%p459_p9)
}
 0x9b8   :  { %373 = dma.vmem_to_hbm [thread:$0]  %s371_s10, 32, %s648_s3, [#allocation9]   ;;  %v337_v17 = vcombine.low %v285_v9, %v286_v10  ;;  %v321_v22 = vcombine.low %v300_v0, %v301_v1  ;;  %v329_v12 = vcombine.low %v313_v14, %v314_v11 }
 0x9b9   :  { %s463_s25 = scalar_lea.vmem %s358_s12, 192  ;;  %p468_p11 = scmp.lt.s32.totalorder %s358_s12, %s358_s12 }
 0x9ba   :  { %386 = vst.sshfl [vmem:[#allocation7 + $0x8] sm:$0x33 pattern:$0x76325410] %v337_v17  ;;  %p464_p10 = scmp.ne.s32.totalorder %s358_s12, %s463_s25  ;;  %p469_p12 = scmp.lt.s32.totalorder %s463_s25, %s463_s25 }
 0x9bb   :  { %384 = vst.sshfl [vmem:[#allocation7] sm:$0x33 pattern:$0x76325410] %v321_v22 }
 0x9bc   :  { %385 = vst.sshfl [vmem:[#allocation7 + $0x4] sm:$0x33 pattern:$0x76325410] %v329_v12  ;;  %p470_p13 = por %p469_p12, %p468_p11 }
 0x9be   :  { %p471_p0 = pnand %p470_p13, %p464_p10 }
 0x9c0   :  { %474 = shalt.err (!%p471_p0)
}
 0x9c1   :  { %s475_s28 = scalar_lea.hbm %s647_s2, 192 }
 0x9c2   :  { %p476_p1 = scmp.ne.s32.totalorder %s647_s2, %s475_s28  ;;  %p479_p2 = scmp.lt.u32.totalorder %s475_s28, %s647_s2 }
 0x9c4   :  { %p481_p3 = pnand %p479_p2, %p476_p1 }
 0x9c6   :  { %484 = shalt.err (!%p481_p3)
}
 0x9c7   :  { %363 = dma.vmem_to_hbm [thread:$0]  %s358_s12, 192, %s647_s2, [#allocation4], %s494_s22, %s494_s22, %s495_s23  }
 0x9c8   :  { %489 = dma.done.wait [#allocation4], 192  }
 0x9c9   :  { %490 = vsyncadd [#allocation4], 4294967104 }
 0x9ca   :  { %491 = dma.done.wait [#allocation9], 32  }
 0x9cb   :  { %492 = vsyncadd [#allocation9], 4294967264 }
 0x9cc   :  { %380 = vsyncpa [#allocation3], 1 }
 0x9cd   :  { %381 = vsyncpa [#allocation6], 1 }
 0x9ce   :  { %382 = vsyncpa [#allocation4], 1 }
 0x9cf   :  { %383 = vsyncpa [#allocation9], 1 }

</bundles_post_ra>
